<compile_context>
chip_gen: v7x
topology: tpu7x:2x2x1
jax: 0.10.0
libtpu: 0.0.40
codegen_flags: <defaults>
</compile_context>

<pallas_src>
import functools

import jax
import jax.numpy as jnp
from jax.experimental import pallas as pl
from jax.experimental.pallas import tpu as pltpu


def _round_up(x, m):
    return ((x + m - 1) // m) * m


def maml_irt_kernel(emb_ref, diff_ref, in_lab_ref, out_lab_ref,
                    out_mask_ref, train_mask_ref,
                    prob_ref, partial_ref,
                    *, batch_size, n_question, block_m, ragged):
    i = pl.program_id(0)

    emb = emb_ref[...].astype(jnp.float32)              # (bm, 1)  meta_param
    diff = diff_ref[...].astype(jnp.float32)            # (1, N)   question_difficulty
    x = emb - diff                                      # logits: theta_b - beta_j

    in_lab = in_lab_ref[...].astype(jnp.float32)        # bf16/f32 -> f32 (0/1 exact)
    out_lab = out_lab_ref[...].astype(jnp.float32)
    out_mask = out_mask_ref[...].astype(jnp.float32)
    train_mask = train_mask_ref[...].astype(jnp.float32)

    if ragged:
        # Last batch tile overhangs the arrays: its out-of-bounds rows carry
        # undefined data (NaN in interpret mode), so clamp everything they feed
        # to harmless finite values and zero every mask before accumulation.
        row = i * block_m + jax.lax.broadcasted_iota(jnp.int32, (block_m, 1), 0)
        valid = row < batch_size                         # (bm, 1) bool
        x = jnp.where(valid, x, 0.0)
        in_lab = jnp.where(valid, in_lab, 0.0)
        out_lab = jnp.where(valid, out_lab, 0.0)
        out_mask = jnp.where(valid, out_mask, 0.0)
        train_mask = jnp.where(valid, train_mask, 0.0)

    # Shared transcendental work: one exp + one log1p over (bm, N).
    e = jnp.exp(-jnp.abs(x))                             # exp(-|x|)
    t = jnp.maximum(x, 0.0) + jnp.log1p(e)               # stable-BCE shared term
    r = 1.0 / (1.0 + e)                                  # exact (free under HBM bound)
    prob = jnp.where(x >= 0.0, r, e * r)                 # sigmoid(x)
    prob_ref[...] = prob.astype(prob_ref.dtype)

    # BCEWithLogits(x, y) = t - x*y
    p_out = jnp.sum((t - x * out_lab) * out_mask)        # output_loss partial (un-normalized)
    p_tr = jnp.sum((t - x * in_lab) * train_mask)        # train_loss partial

    # seq_loss: analytic gradients of the BCE sums w.r.t. student_embed (per row).
    dbce = prob - out_lab                                 # d BCE / d logits
    grad_s = jnp.sum(dbce * out_mask, axis=1, keepdims=True)   # (bm, 1)
    grad_q = jnp.sum(dbce, axis=1, keepdims=True)               # (bm, 1)
    counts = jnp.sum(out_mask, axis=1, keepdims=True) + 1e-8
    gd = grad_s / counts - grad_q * (1.0 / n_question)
    if ragged:
        gd = jnp.where(valid, gd, 0.0)                    # grad_q term is un-masked
    p_seq = jnp.sum(gd * gd)

    # Per-tile partial losses -> one lane-dense (8, 128) slab per grid step.
    lane = jax.lax.broadcasted_iota(jnp.int32, (8, 128), 1)
    sub = jax.lax.broadcasted_iota(jnp.int32, (8, 128), 0)
    row0 = sub == 0
    slab = jnp.where(row0 & (lane == 0), p_out,
                     jnp.where(row0 & (lane == 1), p_tr,
                               jnp.where(row0 & (lane == 2), p_seq, 0.0)))
    partial_ref[...] = slab[None].astype(jnp.float32)


def maml_forward(student_embed, question_difficulty, input_labels,
                 output_labels, output_mask, train_mask, *, block_m=1024,
                 prob_dtype=jnp.float32, vmem_budget_bytes=32 * 1024 * 1024):
    """Equivalent of MAMLModel.forward(batch, config) with tp='irt', mode='train'.

    Labels/masks may be passed in any float dtype (bf16 recommended for 0/1
    data); the kernel upcasts per tile, so the wrapper performs no extra HBM
    passes (no pad / cast / slice).
    """
    B, N = input_labels.shape

    # Batch tile: sublane-aligned, as large as the double-buffered VMEM budget
    # allows, never larger than the (rounded-up) batch.
    in_bytes = sum(jnp.dtype(a.dtype).itemsize for a in
                   (input_labels, output_labels, output_mask, train_mask))
    row_bytes = N * (in_bytes + jnp.dtype(prob_dtype).itemsize) + 8
    bm_cap = max(8, (vmem_budget_bytes // (2 * row_bytes)) // 8 * 8)
    bm = max(8, min(_round_up(min(block_m, B), 8), bm_cap))
    grid = (pl.cdiv(B, bm),)
    ragged = (B % bm) != 0

    kernel = functools.partial(
        maml_irt_kernel, batch_size=B, n_question=N, block_m=bm, ragged=ragged)

    prob, partials = pl.pallas_call(
        kernel,
        grid=grid,
        in_specs=[
            pl.BlockSpec((bm, 1), lambda i: (i, 0)),      # student_embed tile
            pl.BlockSpec((1, N), lambda i: (0, 0)),       # question_difficulty (DMA'd once)
            pl.BlockSpec((bm, N), lambda i: (i, 0)),      # input_labels
            pl.BlockSpec((bm, N), lambda i: (i, 0)),      # output_labels
            pl.BlockSpec((bm, N), lambda i: (i, 0)),      # output_mask
            pl.BlockSpec((bm, N), lambda i: (i, 0)),      # train_mask
        ],
        out_specs=(
            pl.BlockSpec((bm, N), lambda i: (i, 0)),        # sigmoid(output)
            pl.BlockSpec((1, 8, 128), lambda i: (i, 0, 0)),  # per-tile partial losses
        ),
        out_shape=(
            jax.ShapeDtypeStruct((B, N), prob_dtype),
            jax.ShapeDtypeStruct((grid[0], 8, 128), jnp.float32),
        ),
        compiler_params=pltpu.CompilerParams(
            dimension_semantics=("parallel",),              # no cross-tile carry anymore
            vmem_limit_bytes=48 * 1024 * 1024),
    )(student_embed, question_difficulty, input_labels,
      output_labels, output_mask, train_mask)

    # Tiny cross-tile reduction (3 scalars per tile) done in XLA.
    p = jnp.sum(partials[:, 0, :], axis=0)
    inv_b = jnp.float32(1.0 / B)
    return {
        "loss": p[0] * inv_b,
        "train_loss": p[1],
        "seq_loss": jnp.sqrt(p[2]) * inv_b,
        "output": prob,
    }


def _bce_with_logits(x, y):
    return jnp.maximum(x, 0.0) - x * y + jnp.log1p(jnp.exp(-jnp.abs(x)))


def _reference(student_embed, question_difficulty, input_labels,
               output_labels, output_mask, train_mask):
    f32 = jnp.float32
    logits = student_embed.astype(f32) - question_difficulty.astype(f32)
    input_labels = input_labels.astype(f32)
    output_labels = output_labels.astype(f32)
    output_mask = output_mask.astype(f32)
    train_mask = train_mask.astype(f32)
    prob = jax.nn.sigmoid(logits)
    B, N = logits.shape
    out_loss = jnp.sum(_bce_with_logits(logits, output_labels) * output_mask) / B
    train_loss = jnp.sum(_bce_with_logits(logits, input_labels) * train_mask)
    dbce = prob - output_labels
    grad_s = jnp.sum(dbce * output_mask, axis=1, keepdims=True)
    grad_q = jnp.sum(dbce, axis=1, keepdims=True)
    counts = jnp.sum(output_mask, axis=1, keepdims=True) + 1e-8
    gd = grad_s / counts - grad_q / N
    seq_loss = jnp.sqrt(jnp.sum(gd * gd)) / B
    return prob, out_loss, train_loss, seq_loss


def _check(B, N, key, block_m):
    k_emb, k_diff, k_il, k_ol, k_om, k_tm = jax.random.split(key, 6)
    student_embed = jax.random.normal(k_emb, (B, 1), dtype=jnp.float32)            # meta_param
    question_difficulty = 0.1 * jax.random.normal(k_diff, (1, N), jnp.float32)     # (question_dim, n_question)
    # 0/1 labels & masks shipped in bf16 (exact for 0/1) to halve input bytes.
    input_labels = jax.random.bernoulli(k_il, 0.5, (B, N)).astype(jnp.bfloat16)
    output_labels = jax.random.bernoulli(k_ol, 0.5, (B, N)).astype(jnp.bfloat16)
    output_mask = jax.random.bernoulli(k_om, 0.6, (B, N)).astype(jnp.bfloat16)
    train_mask = jax.random.bernoulli(k_tm, 10.0 / N, (B, N)).astype(jnp.bfloat16)  # ~n_query picks/row

    result = maml_forward(student_embed, question_difficulty, input_labels,
                          output_labels, output_mask, train_mask, block_m=block_m)
    jax.block_until_ready(result)

    ref_prob, ref_loss, ref_tloss, ref_sloss = _reference(
        student_embed, question_difficulty, input_labels,
        output_labels, output_mask, train_mask)

    assert result["output"].shape == (B, N)
    assert jnp.allclose(result["output"], ref_prob, atol=1e-5)
    assert jnp.allclose(result["loss"], ref_loss, atol=1e-4, rtol=1e-4)
    assert jnp.allclose(result["train_loss"], ref_tloss, atol=1e-4, rtol=1e-4)
    assert jnp.allclose(result["seq_loss"], ref_sloss, atol=1e-5, rtol=1e-3)


if __name__ == "__main__":
    key = jax.random.PRNGKey(0)
    k1, k2 = jax.random.split(key, 2)
    # B=20, block_m=8: 3 batch tiles with a ragged last tile (rows 16..19 valid).
    _check(B=20, N=128, key=k1, block_m=8)
    # B=16, block_m=8: evenly divided grid (non-ragged path).
    _check(B=16, N=128, key=k2, block_m=8)
    print("KERNEL_OK")
</pallas_src>

<mosaic_0001>
module attributes {stable_mosaic.version = 11 : i64} {
  func.func @maml_irt_kernel(%arg0: i32, %arg1: memref<8x1xf32, #tpu.memory_space<vmem>>, %arg2: memref<1x128xf32, #tpu.memory_space<vmem>>, %arg3: memref<8x128xbf16, #tpu.memory_space<vmem>>, %arg4: memref<8x128xbf16, #tpu.memory_space<vmem>>, %arg5: memref<8x128xbf16, #tpu.memory_space<vmem>>, %arg6: memref<8x128xbf16, #tpu.memory_space<vmem>>, %arg7: memref<8x128xf32, #tpu.memory_space<vmem>>, %arg8: memref<1x8x128xf32, #tpu.memory_space<vmem>>) attributes {dimension_semantics = [#tpu.dimension_semantics<parallel>], iteration_bounds = array<i64: 3>, scalar_prefetch = 0 : i64, scratch_operands = 0 : i64, tpu.core_type = #tpu.core_type<tc>, window_params = [{transform_indices = @transform_0, window_bounds = array<i64: 8, 1>}, {pipeline_mode = #tpu.pipeline_mode<synchronous>, transform_indices = @transform_1, window_bounds = array<i64: 1, 128>}, {transform_indices = @transform_2, window_bounds = array<i64: 8, 128>}, {transform_indices = @transform_3, window_bounds = array<i64: 8, 128>}, {transform_indices = @transform_4, window_bounds = array<i64: 8, 128>}, {transform_indices = @transform_5, window_bounds = array<i64: 8, 128>}, {transform_indices = @transform_6, window_bounds = array<i64: 8, 128>}, {transform_indices = @transform_7, window_bounds = array<i64: 1, 8, 128>}]} {
    %c0 = arith.constant 0 : index
    %c0_0 = arith.constant 0 : index
    %0 = vector.load %arg1[%c0, %c0_0] : memref<8x1xf32, #tpu.memory_space<vmem>>, vector<8x1xf32>
    %c0_1 = arith.constant 0 : index
    %c0_2 = arith.constant 0 : index
    %1 = vector.load %arg2[%c0_1, %c0_2] : memref<1x128xf32, #tpu.memory_space<vmem>>, vector<1x128xf32>
    %2 = vector.broadcast %0 : vector<8x1xf32> to vector<8x128xf32>
    %3 = vector.broadcast %1 : vector<1x128xf32> to vector<8x128xf32>
    %4 = arith.subf %2, %3 : vector<8x128xf32>
    %c0_3 = arith.constant 0 : index
    %c0_4 = arith.constant 0 : index
    %5 = vector.load %arg3[%c0_3, %c0_4] : memref<8x128xbf16, #tpu.memory_space<vmem>>, vector<8x128xbf16>
    %6 = arith.extf %5 : vector<8x128xbf16> to vector<8x128xf32>
    %c0_5 = arith.constant 0 : index
    %c0_6 = arith.constant 0 : index
    %7 = vector.load %arg4[%c0_5, %c0_6] : memref<8x128xbf16, #tpu.memory_space<vmem>>, vector<8x128xbf16>
    %8 = arith.extf %7 : vector<8x128xbf16> to vector<8x128xf32>
    %c0_7 = arith.constant 0 : index
    %c0_8 = arith.constant 0 : index
    %9 = vector.load %arg5[%c0_7, %c0_8] : memref<8x128xbf16, #tpu.memory_space<vmem>>, vector<8x128xbf16>
    %10 = arith.extf %9 : vector<8x128xbf16> to vector<8x128xf32>
    %c0_9 = arith.constant 0 : index
    %c0_10 = arith.constant 0 : index
    %11 = vector.load %arg6[%c0_9, %c0_10] : memref<8x128xbf16, #tpu.memory_space<vmem>>, vector<8x128xbf16>
    %12 = arith.extf %11 : vector<8x128xbf16> to vector<8x128xf32>
    %c8_i32 = arith.constant 8 : i32
    %13 = arith.muli %arg0, %c8_i32 : i32
    %14 = tpu.iota {dimensions = array<i32: 0>} : vector<8x1xi32>
    %15 = vector.broadcast %13 : i32 to vector<8x1xi32>
    %16 = arith.addi %15, %14 : vector<8x1xi32>
    %c20_i32 = arith.constant 20 : i32
    %17 = vector.broadcast %c20_i32 : i32 to vector<8x1xi32>
    %18 = arith.cmpi slt, %16, %17 : vector<8x1xi32>
    %cst = arith.constant 0.000000e+00 : f32
    %19 = vector.shape_cast %18 : vector<8x1xi1> to vector<8x1xi1>
    %20 = vector.broadcast %19 : vector<8x1xi1> to vector<8x128xi1>
    %21 = vector.broadcast %cst : f32 to vector<8x128xf32>
    %22 = arith.select %20, %4, %21 : vector<8x128xi1>, vector<8x128xf32>
    %cst_11 = arith.constant 0.000000e+00 : f32
    %23 = vector.shape_cast %18 : vector<8x1xi1> to vector<8x1xi1>
    %24 = vector.broadcast %23 : vector<8x1xi1> to vector<8x128xi1>
    %25 = vector.broadcast %cst_11 : f32 to vector<8x128xf32>
    %26 = arith.select %24, %6, %25 : vector<8x128xi1>, vector<8x128xf32>
    %cst_12 = arith.constant 0.000000e+00 : f32
    %27 = vector.shape_cast %18 : vector<8x1xi1> to vector<8x1xi1>
    %28 = vector.broadcast %27 : vector<8x1xi1> to vector<8x128xi1>
    %29 = vector.broadcast %cst_12 : f32 to vector<8x128xf32>
    %30 = arith.select %28, %8, %29 : vector<8x128xi1>, vector<8x128xf32>
    %cst_13 = arith.constant 0.000000e+00 : f32
    %31 = vector.shape_cast %18 : vector<8x1xi1> to vector<8x1xi1>
    %32 = vector.broadcast %31 : vector<8x1xi1> to vector<8x128xi1>
    %33 = vector.broadcast %cst_13 : f32 to vector<8x128xf32>
    %34 = arith.select %32, %10, %33 : vector<8x128xi1>, vector<8x128xf32>
    %cst_14 = arith.constant 0.000000e+00 : f32
    %35 = vector.shape_cast %18 : vector<8x1xi1> to vector<8x1xi1>
    %36 = vector.broadcast %35 : vector<8x1xi1> to vector<8x128xi1>
    %37 = vector.broadcast %cst_14 : f32 to vector<8x128xf32>
    %38 = arith.select %36, %12, %37 : vector<8x128xi1>, vector<8x128xf32>
    %39 = math.absf %22 : vector<8x128xf32>
    %cst_15 = arith.constant 0.000000e+00 : f32
    %40 = vector.broadcast %cst_15 : f32 to vector<8x128xf32>
    %41 = arith.subf %40, %39 : vector<8x128xf32>
    %42 = math.exp %41 : vector<8x128xf32>
    %cst_16 = arith.constant 0.000000e+00 : f32
    %43 = vector.broadcast %cst_16 : f32 to vector<8x128xf32>
    %44 = arith.maximumf %22, %43 : vector<8x128xf32>
    %45 = math.log1p %42 : vector<8x128xf32>
    %46 = arith.addf %44, %45 : vector<8x128xf32>
    %cst_17 = arith.constant 1.000000e+00 : f32
    %47 = vector.broadcast %cst_17 : f32 to vector<8x128xf32>
    %48 = arith.addf %47, %42 : vector<8x128xf32>
    %cst_18 = arith.constant 1.000000e+00 : f32
    %49 = vector.broadcast %cst_18 : f32 to vector<8x128xf32>
    %50 = arith.divf %49, %48 : vector<8x128xf32>
    %cst_19 = arith.constant 0.000000e+00 : f32
    %51 = vector.broadcast %cst_19 : f32 to vector<8x128xf32>
    %52 = arith.cmpf oge, %22, %51 : vector<8x128xf32>
    %53 = arith.mulf %42, %50 : vector<8x128xf32>
    %54 = arith.select %52, %50, %53 : vector<8x128xi1>, vector<8x128xf32>
    %c0_20 = arith.constant 0 : index
    %c0_21 = arith.constant 0 : index
    %55 = vector.load %arg7[%c0_20, %c0_21] : memref<8x128xf32, #tpu.memory_space<vmem>>, vector<8x128xf32>
    tpu.vector_store %arg7[%c0_20, %c0_21], %54 {strides = array<i32>} : memref<8x128xf32, #tpu.memory_space<vmem>>, vector<8x128xf32>,
    %56 = arith.mulf %22, %30 : vector<8x128xf32>
    %57 = arith.subf %46, %56 : vector<8x128xf32>
    %58 = arith.mulf %57, %34 : vector<8x128xf32>
    %59 = vector.shape_cast %58 : vector<8x128xf32> to vector<1x8x128xf32>
    %cst_22 = arith.constant dense<0.000000e+00> : vector<1xf32>
    %60 = vector.multi_reduction <add>, %59, %cst_22 [1, 2] : vector<1x8x128xf32> to vector<1xf32>
    %61 = vector.shape_cast %60 : vector<1xf32> to vector<1x1x1xf32>
    %62 = vector.extract %61[0, 0, 0] : f32 from vector<1x1x1xf32>
    %63 = arith.mulf %22, %26 : vector<8x128xf32>
    %64 = arith.subf %46, %63 : vector<8x128xf32>
    %65 = arith.mulf %64, %38 : vector<8x128xf32>
    %66 = vector.shape_cast %65 : vector<8x128xf32> to vector<1x8x128xf32>
    %cst_23 = arith.constant dense<0.000000e+00> : vector<1xf32>
    %67 = vector.multi_reduction <add>, %66, %cst_23 [1, 2] : vector<1x8x128xf32> to vector<1xf32>
    %68 = vector.shape_cast %67 : vector<1xf32> to vector<1x1x1xf32>
    %69 = vector.extract %68[0, 0, 0] : f32 from vector<1x1x1xf32>
    %70 = arith.subf %54, %30 : vector<8x128xf32>
    %71 = arith.mulf %70, %34 : vector<8x128xf32>
    %cst_24 = arith.constant dense<0.000000e+00> : vector<8xf32>
    %72 = vector.multi_reduction <add>, %71, %cst_24 [1] : vector<8x128xf32> to vector<8xf32>
    %73 = vector.shape_cast %72 : vector<8xf32> to vector<8x1xf32>
    %cst_25 = arith.constant dense<0.000000e+00> : vector<8xf32>
    %74 = vector.multi_reduction <add>, %70, %cst_25 [1] : vector<8x128xf32> to vector<8xf32>
    %75 = vector.shape_cast %74 : vector<8xf32> to vector<8x1xf32>
    %cst_26 = arith.constant dense<0.000000e+00> : vector<8xf32>
    %76 = vector.multi_reduction <add>, %34, %cst_26 [1] : vector<8x128xf32> to vector<8xf32>
    %77 = vector.shape_cast %76 : vector<8xf32> to vector<8x1xf32>
    %cst_27 = arith.constant 9.99999993E-9 : f32
    %78 = vector.broadcast %cst_27 : f32 to vector<8x1xf32>
    %79 = arith.addf %77, %78 : vector<8x1xf32>
    %80 = arith.divf %73, %79 : vector<8x1xf32>
    %cst_28 = arith.constant 7.812500e-03 : f32
    %81 = vector.broadcast %cst_28 : f32 to vector<8x1xf32>
    %82 = arith.mulf %75, %81 : vector<8x1xf32>
    %83 = arith.subf %80, %82 : vector<8x1xf32>
    %cst_29 = arith.constant 0.000000e+00 : f32
    %84 = vector.broadcast %cst_29 : f32 to vector<8x1xf32>
    %85 = arith.select %18, %83, %84 : vector<8x1xi1>, vector<8x1xf32>
    %86 = arith.mulf %85, %85 : vector<8x1xf32>
    %87 = vector.shape_cast %86 : vector<8x1xf32> to vector<1x8x1xf32>
    %cst_30 = arith.constant dense<0.000000e+00> : vector<1xf32>
    %88 = vector.multi_reduction <add>, %87, %cst_30 [1, 2] : vector<1x8x1xf32> to vector<1xf32>
    %89 = vector.shape_cast %88 : vector<1xf32> to vector<1x1x1xf32>
    %90 = vector.extract %89[0, 0, 0] : f32 from vector<1x1x1xf32>
    %91 = tpu.iota {dimensions = array<i32: 1>} : vector<8x128xi32>
    %92 = tpu.iota {dimensions = array<i32: 0>} : vector<8x128xi32>
    %c0_i32 = arith.constant 0 : i32
    %93 = vector.broadcast %c0_i32 : i32 to vector<8x128xi32>
    %94 = arith.cmpi eq, %92, %93 : vector<8x128xi32>
    %c0_i32_31 = arith.constant 0 : i32
    %95 = vector.broadcast %c0_i32_31 : i32 to vector<8x128xi32>
    %96 = arith.cmpi eq, %91, %95 : vector<8x128xi32>
    %97 = arith.andi %94, %96 : vector<8x128xi1>
    %c1_i32 = arith.constant 1 : i32
    %98 = vector.broadcast %c1_i32 : i32 to vector<8x128xi32>
    %99 = arith.cmpi eq, %91, %98 : vector<8x128xi32>
    %100 = arith.andi %94, %99 : vector<8x128xi1>
    %c2_i32 = arith.constant 2 : i32
    %101 = vector.broadcast %c2_i32 : i32 to vector<8x128xi32>
    %102 = arith.cmpi eq, %91, %101 : vector<8x128xi32>
    %103 = arith.andi %94, %102 : vector<8x128xi1>
    %cst_32 = arith.constant 0.000000e+00 : f32
    %104 = vector.broadcast %90 : f32 to vector<8x128xf32>
    %105 = vector.broadcast %cst_32 : f32 to vector<8x128xf32>
    %106 = arith.select %103, %104, %105 : vector<8x128xi1>, vector<8x128xf32>
    %107 = vector.broadcast %69 : f32 to vector<8x128xf32>
    %108 = arith.select %100, %107, %106 : vector<8x128xi1>, vector<8x128xf32>
    %109 = vector.broadcast %62 : f32 to vector<8x128xf32>
    %110 = arith.select %97, %109, %108 : vector<8x128xi1>, vector<8x128xf32>
    %111 = vector.shape_cast %110 : vector<8x128xf32> to vector<1x8x128xf32>
    %c0_33 = arith.constant 0 : index
    %c0_34 = arith.constant 0 : index
    %c0_35 = arith.constant 0 : index
    %112 = vector.load %arg8[%c0_33, %c0_34, %c0_35] : memref<1x8x128xf32, #tpu.memory_space<vmem>>, vector<1x8x128xf32>
    tpu.vector_store %arg8[%c0_33, %c0_34, %c0_35], %111 {strides = array<i32>} : memref<1x8x128xf32, #tpu.memory_space<vmem>>, vector<1x8x128xf32>,
    return
  }
  func.func @transform_0(%arg0: i32) -> (i32, i32) {
    %c0_i32 = arith.constant 0 : i32
    %c0_i32_0 = arith.constant 0 : i32
    return %arg0, %c0_i32 : i32, i32
  }
  func.func @transform_1(%arg0: i32) -> (i32, i32) {
    %c0_i32 = arith.constant 0 : i32
    %c0_i32_0 = arith.constant 0 : i32
    %c0_i32_1 = arith.constant 0 : i32
    return %c0_i32, %c0_i32_0 : i32, i32
  }
  func.func @transform_2(%arg0: i32) -> (i32, i32) {
    %c0_i32 = arith.constant 0 : i32
    %c0_i32_0 = arith.constant 0 : i32
    return %arg0, %c0_i32 : i32, i32
  }
  func.func @transform_3(%arg0: i32) -> (i32, i32) {
    %c0_i32 = arith.constant 0 : i32
    %c0_i32_0 = arith.constant 0 : i32
    return %arg0, %c0_i32 : i32, i32
  }
  func.func @transform_4(%arg0: i32) -> (i32, i32) {
    %c0_i32 = arith.constant 0 : i32
    %c0_i32_0 = arith.constant 0 : i32
    return %arg0, %c0_i32 : i32, i32
  }
  func.func @transform_5(%arg0: i32) -> (i32, i32) {
    %c0_i32 = arith.constant 0 : i32
    %c0_i32_0 = arith.constant 0 : i32
    return %arg0, %c0_i32 : i32, i32
  }
  func.func @transform_6(%arg0: i32) -> (i32, i32) {
    %c0_i32 = arith.constant 0 : i32
    %c0_i32_0 = arith.constant 0 : i32
    return %arg0, %c0_i32 : i32, i32
  }
  func.func @transform_7(%arg0: i32) -> (i32, i32, i32) {
    %c0_i32 = arith.constant 0 : i32
    %c0_i32_0 = arith.constant 0 : i32
    %c0_i32_1 = arith.constant 0 : i32
    return %arg0, %c0_i32, %c0_i32_0 : i32, i32, i32
  }
}

</mosaic_0001>

<bundles_post_ra>
// kernel: tpu_custom_call.1
= control target key start
LH: loop header
LB: loop body
LE: loop exit
PB: predicated region body
PF: predicated region fallthrough
CT: control target
= control target key end

     0   :  { %13 = vsyncpa [#allocation3], 0  ;;  %s1290_s0 = inlined_call_operand.vmem [shape: f32[20,1], index: 0, kind: input, shape index: {}]   ;;  %s1291_s1 = inlined_call_operand.hbm [shape: f32[1,128], index: 1, kind: input, shape index: {}]   ;;  %s1292_s2 = inlined_call_operand.vmem [shape: bf16[20,128], index: 2, kind: input, shape index: {}]   ;;  %s1293_s3 = inlined_call_operand.vmem [shape: bf16[20,128], index: 3, kind: input, shape index: {}]   ;;  %s1294_s4 = inlined_call_operand.vmem [shape: bf16[20,128], index: 4, kind: input, shape index: {}]   ;;  %s1295_s5 = inlined_call_operand.hbm [shape: bf16[20,128], index: 5, kind: input, shape index: {}]   ;;  %s1296_s6 = inlined_call_operand.hbm [shape: f32[20,128], index: 6, kind: output, shape index: {0}]   ;;  %s1297_s7 = inlined_call_operand.hbm [shape: f32[3,8,128], index: 7, kind: output, shape index: {1}]  }
   0x1   :  { %14 = vsyncpa [#allocation6], 0 }
   0x2   :  { %16 = vsyncpa [#allocation6 + $0x1], 0 }
   0x3   :  { %17 = vsyncpa [#allocation4], 0 }
   0x4   :  { %19 = vsyncpa [#allocation4 + $0x1], 0 }
   0x5   :  { %20 = vsyncpa [#allocation9], 0 }
   0x6   :  { %22 = vsyncpa [#allocation9 + $0x1], 0  ;;  %s1011_s24 = smov 0   ;;  %s1013_s25 = smov 0  }
   0x7   :  { %s1015_s26 = smov 0   ;;  %s1017_s27 = smov 0  }
   0x8 LB: > { %s1032_s28 = sadd.s32 4294967295, %s964_s27   ;;  %s703_s29 = sadd.s32 4294967294, %s964_s27   ;;  %s964_s27 = sphi %s1017_s27, %s1320_s27   ;;  %s960_s26 = sphi %s1015_s26, %s1319_s26   ;;  %s956_s25 = sphi %s1013_s25, %s1318_s25   ;;  %s952_s24 = sphi %s1011_s24, %s1317_s24  }
   0x9   : > { %p173_p0 = scmp.ne.s32.totalorder %s956_s25, %s952_s24  ;;  %p1298_p1 = scmp.eq.s32.totalorder %s1032_s28, 0 }
   0xa   : > { %p203_p3 = scmp.eq.s32.totalorder %s703_s29, 2  ;;  %p704_p5 = scmp.ge.s32.totalorder %s964_s27, 1 }
   0xb   : > { %p1041_p4 = por %p1298_p1, %p173_p0  ;;  %p236_p7 = scmp.lt.s32.totalorder %s964_s27, 4 }
   0xc   : > { %p1046_p6 = por %p203_p3, %p173_p0  ;;  %s966_s10 = smov [#allocation2]  }
   0xd   : > { %s1301_s30 = scalar_select %p1041_p4, 1, 0 }
   0xe   : > { %s1302_s8 = scalar_select %p1046_p6, 1, 0 }
   0xf   : > { %p1051_p8 = pnand %p704_p5, %p236_p7  ;;  %s249_s11 = sshll.u32 %s966_s10, 4  ;;  %s250_s11 = int_to_ptr.vmem [resolvable:$true] %s249_s11 }
  0x10   : > { %s1058_s12 = sadd.s32 1, %s964_s27   ;;  %s160_s16 = sadd.s32 1, %s960_s26 }
  0x11   : > { %s1303_s9 = scalar_select %p1051_p8, 1, 0 }
  0x12   : > { %p742_p9 = pneg %p1051_p8  ;;  %s157_s14 = ssub.s32 %s964_s27, %s1058_s12 }
  0x13   : > { %p1068_p11 = scmp.eq.s32.totalorder %s157_s14, 0  ;;  %s804_s19 = scalar_lea.hbm %s1291_s1, 16 }
  0x14   : > { %p1062_p10 = pnand %p742_p9, %p1298_p1  ;;  %p805_p13 = scmp.ne.s32.totalorder %s1291_s1, %s804_s19 }
  0x15   : > { %s1305_s15 = scalar_select %p1068_p11, 1, 0 }
  0x16   : > { %p806_p0 = pneg %p1062_p10  ;;  %p811_p7 = scmp.lt.u32.totalorder %s804_s19, %s1291_s1 }
  0x18   : > { %p807_p3 = pnand %p806_p0, %p805_p13 }
  0x1a   : > { %p808_p5 = pneg %p807_p3 }
  0x1c   : > { %p813_p9 = pnand %p811_p7, %p808_p5 }
  0x1e   : > { %816 = shalt.err (!%p813_p9)
}
  0x1f   : > { %s817_s29 = scalar_lea.vmem %s250_s11, 16  ;;  %s824_s10 = scalar_lea.vmem %s250_s11, 32 }
  0x20   : > { %p818_p1 = scmp.ne.s32.totalorder %s250_s11, %s817_s29  ;;  %p825_p6 = scmp.lt.s32.totalorder %s250_s11, %s250_s11 }
  0x21   : > { %p826_p4 = scmp.lt.s32.totalorder %s824_s10, %s817_s29 }
  0x22   : > { %p820_p2 = pnand %p818_p1, %p806_p0 }
  0x23   : > { %p827_p8 = por %p826_p4, %p825_p6 }
  0x24   : > { %p821_p12 = pneg %p820_p2 }
  0x26   : > { %p828_p11 = pnand %p827_p8, %p821_p12 }
  0x28   : > { %831 = shalt.err (!%p828_p11)
}
  0x29   : > { %745 = dma.hbm_to_vmem [thread:$0]  (!%p1062_p10), %s1291_s1, 16, %s250_s11, [#allocation3]  }
  0x2a   : > { %p1306_p1 = scmp.ne.s32.totalorder %s1305_s15, 0  ;;  %p168_p2 = scmp.eq.s32.totalorder %s964_s27, 0 }
  0x2b   : > { %p1307_p4 = scmp.ne.s32.totalorder %s960_s26, %s956_s25  ;;  %p1308_p6 = scmp.eq.s32.totalorder %s1032_s28, 2 }
  0x2c   : > { %s1094_s18 = scalar_select %p1306_p1, %s960_s26, %s160_s16  }
  0x2d   : > { %p1102_p8 = por %p1308_p6, %p1307_p4  ;;  %p758_p11 = scmp.lt.s32.totalorder %s964_s27, 3 }
  0x2e   : > { %s288_s19 = sand.u32 1, %s960_s26   ;;  %p1310_p12 = pmov %p1307_p4 }
  0x2f   : > { %s707_s20 = sshll.u32 %s288_s19, 2  ;;  %s708_s21 = sshll.u32 %s964_s27, 6 }
  0x30   : > { %p169_p13 = por %p168_p2, %p1310_p12  ;;  %s1115_s11 = scalar_lea.hbm %s1295_s5, %s708_s21 }
  0x31   : > { %s292_s15 = scalar_lea.vmem [#allocation5], %s707_s20  ;;  %s289_s10 = scalar_lea.sflag [#allocation6], %s288_s19 }
  0x32   : > { %s299_s16 = sshll.u32 %s292_s15, 4  ;;  %p1117_p10 = pnand %p758_p11, %p169_p13  ;;  %s1121_s16 = int_to_ptr.vmem [resolvable:$true] %s299_s16 }
  0x33   : > { %s832_s14 = scalar_lea.hbm %s1115_s11, 64  ;;  %s837_s21 = scalar_lea.hbm %s1295_s5, 192 }
  0x34   : > { %p833_p0 = scmp.ne.s32.totalorder %s1115_s11, %s832_s14  ;;  %p834_p3 = pneg %p1117_p10 }
  0x35   : > { %p838_p9 = scmp.lt.u32.totalorder %s1115_s11, %s1295_s5  ;;  %p839_p1 = scmp.lt.u32.totalorder %s837_s21, %s832_s14 }
  0x36   : > { %p835_p5 = pnand %p834_p3, %p833_p0  ;;  %p841_p4 = scmp.lt.u32.totalorder %s832_s14, %s1115_s11 }
  0x37   : > { %p840_p2 = por %p839_p1, %p838_p9 }
  0x38   : > { %p836_p7 = pneg %p835_p5 }
  0x39   : > { %p842_p6 = por %p841_p4, %p840_p2 }
  0x3b   : > { %p843_p11 = pnand %p842_p6, %p836_p7 }
  0x3d   : > { %846 = shalt.err (!%p843_p11)
}
  0x3e   : > { %s847_s19 = scalar_lea.vmem %s1121_s16, 64  ;;  %s967_s15 = smov [#allocation5]  }
  0x3f   : > { %p848_p12 = scmp.ne.s32.totalorder %s1121_s16, %s847_s19  ;;  %s852_s17 = sshll.u32 %s967_s15, 4  ;;  %s853_s17 = int_to_ptr.vmem [resolvable:$false] %s852_s17 }
  0x40   : > { %s854_s20 = scalar_lea.vmem %s853_s17, 128  ;;  %p855_p5 = scmp.lt.s32.totalorder %s1121_s16, %s853_s17 }
  0x41   : > { %p850_p13 = pnand %p848_p12, %p834_p3  ;;  %p856_p9 = scmp.lt.s32.totalorder %s854_s20, %s847_s19 }
  0x43   : > { %p851_p0 = pneg %p850_p13  ;;  %p857_p1 = por %p856_p9, %p855_p5 }
  0x45   : > { %p858_p2 = pnand %p857_p1, %p851_p0 }
  0x47   : > { %861 = shalt.err (!%p858_p2)
}
  0x48   : > { %749 = dma.hbm_to_vmem [thread:$0]  (!%p1117_p10), %s1115_s11, 64, %s1121_s16, %s289_s10  }
  0x49   : > { %p1312_p7 = scmp.ne.s32.totalorder %s1303_s9, 0 }
  0x4a   : > { %p1313_p3 = scmp.eq.s32.totalorder (!%p1312_p7), %s1032_s28, 0 }
  0x4b   : > { %308 = sbr.rel (%p1312_p7) target bundleno = 638 (0x27e), region = 44 }
  0x52   : > { %935 = dma.done.wait (%p1313_p3), [#allocation3], 16   ;;  %p1314_p4 = pmov %p1313_p3 }
  0x53   : > { %s1155_s14 = sand.u32 1, %s956_s25   ;;  %p1315_p10 = scmp.ne.s32.totalorder %s1301_s30, 0 }
  0x54   : > { %937 = vsyncadd (%p1314_p4), [#allocation3], 4294967280  ;;  %s711_s21 = sshll.u32 %s1155_s14, 2  ;;  %s315_s29 = scalar_lea.sflag [#allocation6], %s1155_s14 }
  0x55   : > { %s1159_s22 = scalar_lea.vmem [#allocation5], %s711_s21 }
  0x56   : > { %939 = dma.done.wait (%p1315_p10), %s315_s29, 64  }
  0x57   : > { %941 = vsyncadd (%p1315_p10), %s315_s29, 4294967232  ;;  %p370_p6 = scmp.lt.s32.totalorder %s1032_s28, 2  ;;  %v968_v0 = vmov 0   ;;  %v409_v2 = vlaneseq  ;;  %s719_s30 = sshll.u32 %s1032_s28, 3  ;;  %v718_v9 = vld [vmem:[#allocation2] ss:$0 sm:$0xff] }
  0x58   : > { %795 = vset.pattern.permute.xlu0 %v968_v0  ;;  %v411_v4 = vstv %s719_s30  ;;  %v406_v38 = vld [vmem:[%s1159_s22] sm:$0xf]  ;;  %vm482_vm3 = vcmask 7168   ;;  %s722_s22 = sshll.u32 %s1032_s28, 7  ;;  %s510_s21 = scalar_lea.sflag [#allocation4], %s1155_s14 }
  0x59   : > { %s371_s9 = scalar_select %p370_p6, %s1032_s28, 2  ;;  %v1178_v3 = vshrl.u32 %v409_v2, 7  ;;  %v407_v41 = vunpack.c.l.bf16 %v406_v38 }
  0x5a   : > { %s1217_s17 = scalar_lea.hbm %s1296_s6, %s722_s22 }
  0x5b   : > { %s714_s11 = sshll.u32 %s371_s9, 3  ;;  %s1170_s19 = sshll.u32 %s371_s9, 2  ;;  %v1181_v6 = vadd.s32 %v411_v4, %v1178_v3 }
  0x5c   : > { %s373_s23 = scalar_lea.vmem %s1290_s0, %s714_s11  ;;  %s385_s20 = scalar_lea.vmem %s1294_s4, %s1170_s19 }
  0x5d   : > { %v386_v1 = vld [vmem:[%s373_s23] sm:$0xff]  ;;  %vm413_vm0 = vcmp.lt.s32.totalorder %v1181_v6, 20  ;;  %s381_s9 = scalar_lea.vmem %s1293_s3, %s1170_s19  ;;  %s712_s11 = sshll.u32 %s1155_s14, 3 }
  0x5e   : > { %390 = vperm.xlu0 %795, %v386_v1   ;;  %v404_v5 = vld [vmem:[%s385_s20] sm:$0xf]  ;;  %s377_s23 = scalar_lea.vmem %s1292_s2, %s1170_s19  ;;  %s1201_s30 = scalar_lea.vmem [#allocation7], %s712_s11  ;;  %v420_v45 = vsel %vm413_vm0, %v407_v41, 0.0 }
  0x5f   : > { %v405_v7 = vunpack.c.l.bf16 %v404_v5  ;;  %v402_v19 = vld [vmem:[%s381_s9] sm:$0xf]  ;;  %s528_s20 = sshll.u32 %s1201_s30, 4  ;;  %s969_s9 = smov [#allocation7]   ;;  %s529_s20 = int_to_ptr.vmem [resolvable:$true] %s528_s20 }
  0x60   : > { %v403_v21 = vunpack.c.l.bf16 %v402_v19  ;;  %v400_v28 = vld [vmem:[%s377_s23] sm:$0xf]  ;;  %s862_s29 = scalar_lea.vmem %s529_s20, 128  ;;  %s866_s16 = sshll.u32 %s969_s9, 4  ;;  %s867_s16 = int_to_ptr.vmem [resolvable:$false] %s866_s16 }
  0x61   : > { %v419_v8 = vsel %vm413_vm0, %v405_v7, 0.0  ;;  %v401_v34 = vunpack.c.l.bf16 %v400_v28  ;;  %p863_p11 = scmp.ne.s32.totalorder %s529_s20, %s862_s29  ;;  %s868_s10 = scalar_lea.vmem %s867_s16, 256 }
  0x62   : > { %v418_v29 = vsel %vm413_vm0, %v403_v21, 0.0  ;;  %p869_p0 = scmp.lt.s32.totalorder %s529_s20, %s867_s16  ;;  %p870_p5 = scmp.lt.s32.totalorder %s868_s10, %s862_s29 }
  0x63   : > { %v417_v39 = vsel %vm413_vm0, %v401_v34, 0.0  ;;  %p864_p12 = pnand %p863_p11, %p1102_p8 }
  0x64   : > { %p871_p9 = por %p870_p5, %p869_p0 }
  0x65   : > { %p865_p13 = pneg %p864_p12 }
  0x67   : > { %p872_p1 = pnand %p871_p9, %p865_p13 }
  0x7d   : > { %473 = vadd.xlane.f32.xlu0 %v419_v8 }
  0xdd   : > { %v391_v10 = vpop.permute.xlu0 %390 }
  0xde   : > { %v399_v11 = vsub.f32 %v391_v10, %v718_v9 }
  0xe0   : > { %v416_v12 = vsel %vm413_vm0, %v399_v11, 0.0 }
  0xe1   : > { %v421_v13 = vand.u32 2147483647, %v416_v12  ;;  %vm439_vm1 = vcmp.ge.f32.partialorder %v416_v12, 0.0  ;;  %v425_v32 = vmax.f32 %v416_v12, 0.0  ;;  %v443_v37 = vmul.f32 %v418_v29, %v416_v12 }
  0xe2   : > { %v455_v42 = vmul.f32 %v417_v39, %v416_v12 }
  0xe3   : > { %v422_v14 = vsub.f32 0.0, %v421_v13 }
  0xe5   : > { %v423_v15 = vmul.f32 1.442695, %v422_v14 }
  0xe7   : > { %796 = vpow2.f32 %v423_v15 }
  0xf1   : > { %v797_v16 = vpop.eup %796 }
  0xf2   : > { %v426_v17 = vadd.f32 1.0, %v797_v16  ;;  %v429_v18 = vmul.f32 -0.5, %v797_v16  ;;  %v432_v22 = vand.u32 2147483647, %v797_v16 }
  0xf4   : > { %798 = vrcp.f32 %v426_v17  ;;  %v430_v20 = vadd.f32 1.0, %v429_v18  ;;  %vm433_vm2 = vcmp.lt.f32.partialorder %v432_v22, 0.0004427343 }
  0xf5   : > { %800 = vlog2.f32 %v426_v17 }
  0xf6   : > { %v431_v27 = vmul.f32 %v797_v16, %v430_v20 }
  0xfe   : > { %v799_v23 = vpop.eup %798 }
  0xff   : > { %v801_v24 = vpop.eup %800  ;;  %v440_v25 = vmul.f32 %v799_v23, %v797_v16 }
 0x100   : > { %v428_v26 = vmul.f32 0.6931472, %v801_v24 }
 0x101   : > { %v441_v30 = vsel %vm439_vm1, %v799_v23, %v440_v25 }
 0x102   : > { %v467_v31 = vsub.f32 %v441_v30, %v418_v29  ;;  %442 = vst [vmem:[%s1201_s30] sm:$0xff] %v441_v30  ;;  %v434_v33 = vsel %vm433_vm2, %v431_v27, %v428_v26 }
 0x103   : > { %v435_v36 = vadd.f32 %v434_v33, %v425_v32 }
 0x104   : > { %v468_v35 = vmul.f32 %v467_v31, %v419_v8 }
 0x105   : > { %v444_v40 = vsub.f32 %v435_v36, %v443_v37  ;;  %v456_v44 = vsub.f32 %v435_v36, %v455_v42 }
 0x106   : > { %469 = vadd.xlane.f32.xlu1 %v468_v35 }
 0x107   : > { %v445_v43 = vmul.f32 %v444_v40, %v419_v8  ;;  %v457_v46 = vmul.f32 %v456_v44, %v420_v45 }
 0x10a   : > { %471 = vadd.xlane.f32.xlu1 %v467_v31  ;;  %v474_v47 = vpop.xlane.xlu0 %473 }
 0x10b   : > { %v475_v48 = vadd.f32 1e-08, %v474_v47 }
 0x10d   : > { %802 = vrcp.f32 %v475_v48 }
 0x10e   : > { %446 = vadd.xlane.f32.xlu1 %v445_v43 }
 0x112   : > { %458 = vadd.xlane.f32.xlu1 %v457_v46 }
 0x117   : > { %v803_v50 = vpop.eup %802 }
 0x193   : > { %v470_v49 = vpop.xlane.xlu1 %469 }
 0x194   : > { %v477_v52 = vmul.f32 %v803_v50, %v470_v49 }
 0x197   : > { %v472_v51 = vpop.xlane.xlu1 %471 }
 0x198   : > { %v478_v53 = vmul.f32 0.0078125, %v472_v51 }
 0x19a   : > { %v479_v54 = vsub.f32 %v477_v52, %v478_v53 }
 0x19b   : > { %v447_v55 = vpop.xlane.xlu1 %446 }
 0x19c   : > { %v448_v56 = vrot.slane %v447_v55, 4  ;;  %v480_v57 = vsel %vm413_vm0, %v479_v54, 0.0 }
 0x19d   : > { %v481_v58 = vmul.f32 %v480_v57, %v480_v57 }
 0x19e   : > { %v449_v59 = vadd.f32 %v448_v56, %v447_v55 }
 0x19f   : > { %v459_v60 = vpop.xlane.xlu1 %458  ;;  %v483_v61 = vsel %vm482_vm3, %v481_v58, 0.0 }
 0x1a0   : > { %v450_v62 = vrot.slane %v449_v59, 2  ;;  %v460_v63 = vrot.slane %v459_v60, 4  ;;  %484 = vadd.xlane.f32.xlu1 %v483_v61 }
 0x1a2   : > { %v461_v0 = vadd.f32 %v460_v63, %v459_v60  ;;  %v451_v1 = vadd.f32 %v450_v62, %v449_v59 }
 0x1a4   : > { %v462_v4 = vrot.slane %v461_v0, 2  ;;  %v452_v5 = vrot.slane %v451_v1, 1 }
 0x1a6   : > { %v453_v7 = vadd.f32 %v452_v5, %v451_v1  ;;  %v463_v6 = vadd.f32 %v462_v4, %v461_v0 }
 0x1a8   : > { %726 = vpush %v453_v7  ;;  %v464_v8 = vrot.slane %v463_v6, 1 }
 0x1aa   : > { %v465_v9 = vadd.f32 %v464_v8, %v463_v6 }
 0x1ac   : > { %728 = vpush %v465_v9 }
 0x1ad   : > { %875 = shalt.err (!%p872_p1)
}
 0x1ae   : > { %s876_s23 = scalar_lea.hbm %s1217_s17, 128  ;;  %s880_s15 = scalar_lea.hbm %s1296_s6, 384 }
 0x1af   : > { %p877_p2 = scmp.ne.s32.totalorder %s1217_s17, %s876_s23  ;;  %p881_p4 = scmp.lt.u32.totalorder %s1217_s17, %s1296_s6 }
 0x1b0   : > { %p882_p10 = scmp.lt.u32.totalorder %s880_s15, %s876_s23  ;;  %p884_p11 = scmp.lt.u32.totalorder %s876_s23, %s1217_s17 }
 0x1b1   : > { %p878_p7 = pnand %p877_p2, %p1102_p8 }
 0x1b2   : > { %p883_p6 = por %p882_p10, %p881_p4 }
 0x1b3   : > { %p879_p3 = pneg %p878_p7 }
 0x1b4   : > { %p885_p12 = por %p884_p11, %p883_p6 }
 0x1b6   : > { %p886_p13 = pnand %p885_p12, %p879_p3 }
 0x1b8   : > { %889 = shalt.err (!%p886_p13)
}
 0x1b9   : > { %738 = dma.vmem_to_hbm [thread:$0]  (%p1102_p8), %s529_s20, 128, %s1217_s17, %s510_s21   ;;  %v494_v17 = vand.u32 127, %v409_v2  ;;  %vm495_vm4 = vcmp.eq.s32.totalorder %v1178_v3, 0 }
 0x1ba   : > { %s369_s20 = scalar_lea.vmem [#allocation8], %s712_s11  ;;  %s1247_s19 = scalar_lea.hbm %s1297_s7, %s722_s22 }
 0x1bb   : > { %vm500_vm5 = vcmp.eq.s32.totalorder %v494_v17, 2  ;;  %vm498_vm6 = vcmp.eq.s32.totalorder %v494_v17, 1  ;;  %vm496_vm7 = vcmp.eq.s32.totalorder %v494_v17, 0  ;;  %s541_s21 = sshll.u32 %s369_s20, 4  ;;  %s515_s11 = scalar_lea.sflag [#allocation9], %s1155_s14  ;;  %s1249_s21 = int_to_ptr.vmem [resolvable:$true] %s541_s21 }
 0x1bc   : > { %vm501_vm8 = vmand %vm495_vm4, %vm500_vm5  ;;  %s890_s15 = scalar_lea.vmem %s1249_s21, 128  ;;  %s970_s9 = smov [#allocation8]  }
 0x1bd   : > { %vm499_vm9 = vmand %vm495_vm4, %vm498_vm6  ;;  %p891_p0 = scmp.ne.s32.totalorder %s1249_s21, %s890_s15  ;;  %s894_s28 = sshll.u32 %s970_s9, 4  ;;  %s895_s28 = int_to_ptr.vmem [resolvable:$false] %s894_s28 }
 0x1be   : > { %vm497_vm10 = vmand %vm495_vm4, %vm496_vm7  ;;  %s896_s16 = scalar_lea.vmem %s895_s28, 256  ;;  %p897_p1 = scmp.lt.s32.totalorder %s1249_s21, %s895_s28 }
 0x1bf   : > { %p892_p5 = pnand %p891_p0, %p1102_p8  ;;  %p898_p2 = scmp.lt.s32.totalorder %s896_s16, %s890_s15 }
 0x1c1   : > { %p893_p9 = pneg %p892_p5  ;;  %p899_p7 = por %p898_p2, %p897_p1 }
 0x1c3   : > { %p900_p3 = pnand %p899_p7, %p893_p9 }
 0x1d9   : > { %s727_s29 = spop %726 }
 0x1da   : > { %v506_v20 = vstv %s727_s29 }
 0x1dd   : > { %s729_s10 = spop %728 }
 0x1de   : > { %v504_v19 = vstv %s729_s10 }
 0x22d   : > { %v485_v10 = vpop.xlane.xlu1 %484 }
 0x22e   : > { %v486_v11 = vrot.slane %v485_v10, 4 }
 0x230   : > { %v487_v12 = vadd.f32 %v486_v11, %v485_v10 }
 0x232   : > { %v488_v13 = vrot.slane %v487_v12, 2 }
 0x234   : > { %v489_v14 = vadd.f32 %v488_v13, %v487_v12 }
 0x236   : > { %v490_v15 = vrot.slane %v489_v14, 1 }
 0x238   : > { %v491_v16 = vadd.f32 %v490_v15, %v489_v14 }
 0x23a   : > { %730 = vpush %v491_v16 }
 0x26b   : > { %s731_s17 = spop %730 }
 0x26c   : > { %v502_v18 = vstv %s731_s17 }
 0x26d   : > { %v503_v2 = vsel %vm501_vm8, %v502_v18, 0.0 }
 0x26e   : > { %v505_v3 = vsel %vm499_vm9, %v504_v19, %v503_v2 }
 0x26f   : > { %v507_v21 = vsel %vm497_vm10, %v506_v20, %v505_v3 }
 0x270   : > { %508 = vst [vmem:[%s369_s20] sm:$0xff] %v507_v21 }
 0x271   : > { %903 = shalt.err (!%p900_p3)
}
 0x272   : > { %s904_s14 = scalar_lea.hbm %s1247_s19, 128  ;;  %s908_s10 = scalar_lea.hbm %s1297_s7, 384 }
 0x273   : > { %p905_p4 = scmp.ne.s32.totalorder %s1247_s19, %s904_s14  ;;  %p909_p11 = scmp.lt.u32.totalorder %s1247_s19, %s1297_s7 }
 0x274   : > { %p910_p12 = scmp.lt.u32.totalorder %s908_s10, %s904_s14  ;;  %p912_p0 = scmp.lt.u32.totalorder %s904_s14, %s1247_s19 }
 0x275   : > { %p906_p10 = pnand %p905_p4, %p1102_p8 }
 0x276   : > { %p911_p13 = por %p910_p12, %p909_p11 }
 0x277   : > { %p907_p6 = pneg %p906_p10 }
 0x278   : > { %p913_p5 = por %p912_p0, %p911_p13 }
 0x27a   : > { %p914_p9 = pnand %p913_p5, %p907_p6 }
 0x27c   : > { %917 = shalt.err (!%p914_p9)
}
 0x27d   : > { %739 = dma.vmem_to_hbm [thread:$0]  (%p1102_p8), %s1249_s21, 128, %s1247_s19, %s515_s11  }
 0x27e PF: > { %p760_p1 = scmp.ge.s32.totalorder %s964_s27, 2  ;;  %s553_s23 = sand.u32 1, %s952_s24  }
 0x27f   : > { %p1316_p2 = scmp.ne.s32.totalorder %s1302_s8, 0  ;;  %s554_s30 = scalar_lea.sflag [#allocation4], %s553_s23 }
 0x281   : > { %p751_p7 = pnand %p760_p1, %p1316_p2 }
 0x283   : > { %943 = dma.done.wait (!%p751_p7), %s554_s30, 128  }
 0x284   : > { %945 = vsyncadd (!%p751_p7), %s554_s30, 4294967168  ;;  %s563_s15 = scalar_lea.sflag [#allocation9], %s553_s23 }
 0x285   : > { %947 = dma.done.wait (!%p751_p7), %s563_s15, 128  }
 0x286   : > { %949 = vsyncadd (!%p751_p7), %s563_s15, 4294967168  ;;  %p25_p8 = scmp.ge.s32.totalorder %s1058_s12, 5   ;;  %s1317_s24 = smov %s956_s25 }
 0x287   : > { %s1318_s25 = smov %s960_s26  ;;  %s1319_s26 = smov %s1094_s18 }
 0x288   : > { %s1320_s27 = smov %s1058_s12  ;;  %27 = sbr.rel (!%p25_p8) target bundleno = 8 (0x8), region = 123 }
 0x28f   :  { %568 = vsyncpa [#allocation3], 1 }
 0x290   :  { %570 = vsyncpa [#allocation3 + $0x1], 1 }
 0x291   :  { %571 = vsyncpa [#allocation6], 1 }
 0x292   :  { %573 = vsyncpa [#allocation6 + $0x1], 1 }
 0x293   :  { %574 = vsyncpa [#allocation4], 1 }
 0x294   :  { %576 = vsyncpa [#allocation4 + $0x1], 1 }
 0x295   :  { %577 = vsyncpa [#allocation9], 1 }
 0x296   :  { %579 = vsyncpa [#allocation9 + $0x1], 1 }

</bundles_post_ra>
